<compile_context>
chip_gen: v7x
topology: tpu7x:2x2x1
jax: 0.10.0
libtpu: 0.0.40
codegen_flags: <defaults>
</compile_context>

<pallas_src>
import math
from functools import partial

import jax
import jax.numpy as jnp
from jax.experimental import pallas as pl
from jax.experimental.pallas import tpu as pltpu


def prepare_self_attention_params(wq, bq, wk, bk, wv, bv):
    """Init-time parameter prep (run ONCE, not per forward call).

    Folds the 1/sqrt(hidden) softmax scale into the query projection and casts
    the weights to bf16 MXU operands (biases stay f32 for the accumulate path).
    Weights are the pre-transposed nn.Linear parameters:
      wq, wk: (in_dim, hidden)   bq, bk: (hidden,) or (1, hidden)
      wv:     (hidden, hidden)   bv:     (hidden,) or (1, hidden)
    """
    hidden = wq.shape[1]
    scale = 1.0 / math.sqrt(float(hidden))
    return dict(
        wq=(wq * scale).astype(jnp.bfloat16),
        bq=(bq * scale).astype(jnp.float32).reshape(1, hidden),
        wk=wk.astype(jnp.bfloat16),
        bk=bk.astype(jnp.float32).reshape(1, hidden),
        wv=wv.astype(jnp.bfloat16),
        bv=bv.astype(jnp.float32).reshape(1, hidden),
    )


def _self_attention_kernel(xd_ref, xs_ref, fs_ref,
                           wq_ref, bq_ref, wk_ref, bk_ref, wv_ref, bv_ref,
                           o_ref, *, bb, n_dest, n_src):
    hidden = wv_ref.shape[1]
    bf16 = jnp.bfloat16

    # Q/K/V projections with the batch folded into the M (row) dimension:
    # one MXU pass per weight matrix for all `bb` batches in this block.
    # Activations are cast to bf16 here (no wrapper-side HBM cast pass);
    # accumulation is f32, bias add in f32. Softmax scale already folded into wq/bq.
    q = jnp.dot(xd_ref[...].astype(bf16), wq_ref[...],
                preferred_element_type=jnp.float32) + bq_ref[...]
    k = jnp.dot(xs_ref[...].astype(bf16), wk_ref[...],
                preferred_element_type=jnp.float32) + bk_ref[...]
    v = jnp.dot(fs_ref[...].astype(bf16), wv_ref[...],
                preferred_element_type=jnp.float32) + bv_ref[...]

    # Re-introduce the batch dimension only where it is required
    # (per-batch attention contractions). Tile-aligned split of the row dim.
    q3 = q.reshape(bb, n_dest, hidden)
    k3 = k.reshape(bb, n_src, hidden)
    v3 = v.reshape(bb, n_src, hidden)

    # scores = (q*scale) @ k^T as a last-dim contraction (no explicit transpose).
    scores = jnp.einsum('bqd,bkd->bqk', q3.astype(bf16), k3.astype(bf16),
                        preferred_element_type=jnp.float32)

    # softmax in f32 (VPU/EUP); approx reciprocal uses the otherwise-idle EUP slot.
    m = jnp.max(scores, axis=-1, keepdims=True)
    p = jnp.exp(scores - m)
    denom = jnp.sum(p, axis=-1, keepdims=True)
    attn = p * pl.reciprocal(denom, approx=True)

    # TODO(synk): training-mode dropout (pltpu.prng_random_bits mask) not emitted;
    # eval-mode F.dropout(training=False) is the identity.

    out = jnp.einsum('bqk,bkd->bqd', attn.astype(bf16), v3.astype(bf16),
                     preferred_element_type=jnp.float32)

    # activation: nn.LeakyReLU(0.2)
    out = jnp.where(out > 0, out, 0.2 * out)
    o_ref[...] = out.reshape(bb * n_dest, hidden).astype(o_ref.dtype)


def self_attention_layer(emb_dest, emb_src, feature_src, params,
                         batch_block=None):
    """Fused SelfAttentionLayer forward (eval mode).

    Activations may be un-batched (N, D) or batched (B, N, D); `params` comes
    from `prepare_self_attention_params` (init-time prep, bf16 weights,
    scale-folded Q). Returns (B, N_dest, hidden) or (N_dest, hidden), f32.
    """
    squeeze = emb_dest.ndim == 2
    if squeeze:
        emb_dest = emb_dest[None]
        emb_src = emb_src[None]
        feature_src = feature_src[None]

    B, n_dest, in_dim = emb_dest.shape
    n_src = emb_src.shape[1]
    hidden = params['wv'].shape[1]

    # Batch block: default = whole batch in a single grid step (B is small).
    bb = B if batch_block is None else int(batch_block)
    if bb <= 0 or B % bb != 0 or (bb != B and (n_dest % 8 or n_src % 8)):
        bb = B
    steps = B // bb

    # Metadata-only reshapes: fold the batch into the matmul row dimension.
    xd = emb_dest.reshape(B * n_dest, in_dim)
    xs = emb_src.reshape(B * n_src, in_dim)
    fs = feature_src.reshape(B * n_src, hidden)

    out2d = pl.pallas_call(
        partial(_self_attention_kernel, bb=bb, n_dest=n_dest, n_src=n_src),
        out_shape=jax.ShapeDtypeStruct((B * n_dest, hidden), jnp.float32),
        grid=(steps,),
        in_specs=[
            pl.BlockSpec((bb * n_dest, in_dim), lambda i: (i, 0)),
            pl.BlockSpec((bb * n_src, in_dim), lambda i: (i, 0)),
            pl.BlockSpec((bb * n_src, hidden), lambda i: (i, 0)),
            pl.BlockSpec((in_dim, hidden), lambda i: (0, 0)),
            pl.BlockSpec((1, hidden), lambda i: (0, 0)),
            pl.BlockSpec((in_dim, hidden), lambda i: (0, 0)),
            pl.BlockSpec((1, hidden), lambda i: (0, 0)),
            pl.BlockSpec((hidden, hidden), lambda i: (0, 0)),
            pl.BlockSpec((1, hidden), lambda i: (0, 0)),
        ],
        out_specs=pl.BlockSpec((bb * n_dest, hidden), lambda i: (i, 0)),
        compiler_params=pltpu.CompilerParams(
            dimension_semantics=("parallel",)),
    )(xd, xs, fs, params['wq'], params['bq'], params['wk'], params['bk'],
      params['wv'], params['bv'])

    out = out2d.reshape(B, n_dest, hidden)
    return out[0] if squeeze else out


# ----------------------------------------------------------------------------
# References for validation.
# ----------------------------------------------------------------------------
def _reference_f32(emb_dest, emb_src, feature_src, wq, bq, wk, bk, wv, bv):
    """Pure-f32 PyTorch-semantics reference."""
    q = jnp.matmul(emb_dest, wq) + bq
    k = jnp.matmul(emb_src, wk) + bk
    v = jnp.matmul(feature_src, wv) + bv
    scores = jnp.einsum('...qd,...kd->...qk', q, k) / jnp.sqrt(
        jnp.float32(q.shape[-1]))
    attn = jax.nn.softmax(scores, axis=-1)
    out = jnp.einsum('...qk,...kd->...qd', attn, v)
    return jnp.where(out > 0, out, 0.2 * out)


def _reference_bf16(emb_dest, emb_src, feature_src, wq, bq, wk, bk, wv, bv):
    """Reference mirroring the kernel's bf16-operand / f32-accumulate casts."""
    bf = jnp.bfloat16
    scale = 1.0 / math.sqrt(float(wq.shape[1]))
    q = jnp.matmul(emb_dest.astype(bf), (wq * scale).astype(bf),
                   preferred_element_type=jnp.float32) + bq * scale
    k = jnp.matmul(emb_src.astype(bf), wk.astype(bf),
                   preferred_element_type=jnp.float32) + bk
    v = jnp.matmul(feature_src.astype(bf), wv.astype(bf),
                   preferred_element_type=jnp.float32) + bv
    scores = jnp.einsum('...qd,...kd->...qk', q.astype(bf), k.astype(bf),
                        preferred_element_type=jnp.float32)
    attn = jax.nn.softmax(scores, axis=-1)
    out = jnp.einsum('...qk,...kd->...qd', attn.astype(bf), v.astype(bf),
                     preferred_element_type=jnp.float32)
    return jnp.where(out > 0, out, 0.2 * out)


if __name__ == "__main__":
    in_dim, hidden_dim = 16, 32
    n_dest, n_src = 8, 8
    batch = 4

    key = jax.random.PRNGKey(0)
    ks = jax.random.split(key, 9)

    def lin_init(kw, kb, fan_in, fan_out):
        bound = 1.0 / math.sqrt(fan_in)
        w = jax.random.uniform(kw, (fan_in, fan_out), jnp.float32, -bound, bound)
        b = jax.random.uniform(kb, (1, fan_out), jnp.float32, -bound, bound)
        return w, b

    wq, bq = lin_init(ks[0], ks[1], in_dim, hidden_dim)
    wk, bk = lin_init(ks[2], ks[3], in_dim, hidden_dim)
    wv, bv = lin_init(ks[4], ks[5], hidden_dim, hidden_dim)

    emb_dest = jax.random.normal(ks[6], (batch, n_dest, in_dim), jnp.float32)
    emb_src = jax.random.normal(ks[7], (batch, n_src, in_dim), jnp.float32)
    feature_src = jax.random.normal(ks[8], (batch, n_src, hidden_dim), jnp.float32)

    # Init-time weight prep (runs once, outside the per-call forward path).
    params = prepare_self_attention_params(wq, bq, wk, bk, wv, bv)

    # Batched path: whole batch in a single grid step.
    out = self_attention_layer(emb_dest, emb_src, feature_src, params)
    out = jax.block_until_ready(out)
    assert out.shape == (batch, n_dest, hidden_dim)

    ref_bf16 = _reference_bf16(emb_dest, emb_src, feature_src,
                               wq, bq, wk, bk, wv, bv)
    ref_f32 = _reference_f32(emb_dest, emb_src, feature_src,
                             wq, bq, wk, bk, wv, bv)
    assert jnp.allclose(out, ref_bf16, atol=5e-3, rtol=5e-3), \
        "mismatch vs bf16-mirroring reference"
    assert jnp.allclose(out, ref_f32, atol=3e-2, rtol=3e-2), \
        "mismatch vs f32 reference"

    # Un-batched (module-signature) path.
    out_single = self_attention_layer(emb_dest[0], emb_src[0], feature_src[0],
                                      params)
    out_single = jax.block_until_ready(out_single)
    assert out_single.shape == (n_dest, hidden_dim)
    assert jnp.allclose(out_single, out[0], atol=1e-5, rtol=1e-5)

    print("KERNEL_OK")
</pallas_src>

<mosaic_0001>
module attributes {stable_mosaic.version = 11 : i64} {
  func.func @_self_attention_kernel(%arg0: i32, %arg1: memref<32x16xf32, #tpu.memory_space<vmem>>, %arg2: memref<32x16xf32, #tpu.memory_space<vmem>>, %arg3: memref<32x32xf32, #tpu.memory_space<vmem>>, %arg4: memref<16x32xbf16, #tpu.memory_space<vmem>>, %arg5: memref<1x32xf32, #tpu.memory_space<vmem>>, %arg6: memref<16x32xbf16, #tpu.memory_space<vmem>>, %arg7: memref<1x32xf32, #tpu.memory_space<vmem>>, %arg8: memref<32x32xbf16, #tpu.memory_space<vmem>>, %arg9: memref<1x32xf32, #tpu.memory_space<vmem>>, %arg10: memref<32x32xf32, #tpu.memory_space<vmem>>) attributes {dimension_semantics = [#tpu.dimension_semantics<parallel>], iteration_bounds = array<i64: 1>, scalar_prefetch = 0 : i64, scratch_operands = 0 : i64, tpu.core_type = #tpu.core_type<tc>, window_params = [{transform_indices = @transform_0, window_bounds = array<i64: 32, 16>}, {transform_indices = @transform_1, window_bounds = array<i64: 32, 16>}, {transform_indices = @transform_2, window_bounds = array<i64: 32, 32>}, {pipeline_mode = #tpu.pipeline_mode<synchronous>, transform_indices = @transform_3, window_bounds = array<i64: 16, 32>}, {pipeline_mode = #tpu.pipeline_mode<synchronous>, transform_indices = @transform_4, window_bounds = array<i64: 1, 32>}, {pipeline_mode = #tpu.pipeline_mode<synchronous>, transform_indices = @transform_5, window_bounds = array<i64: 16, 32>}, {pipeline_mode = #tpu.pipeline_mode<synchronous>, transform_indices = @transform_6, window_bounds = array<i64: 1, 32>}, {pipeline_mode = #tpu.pipeline_mode<synchronous>, transform_indices = @transform_7, window_bounds = array<i64: 32, 32>}, {pipeline_mode = #tpu.pipeline_mode<synchronous>, transform_indices = @transform_8, window_bounds = array<i64: 1, 32>}, {transform_indices = @transform_9, window_bounds = array<i64: 32, 32>}]} {
    %c0 = arith.constant 0 : index
    %c0_0 = arith.constant 0 : index
    %0 = vector.load %arg1[%c0, %c0_0] : memref<32x16xf32, #tpu.memory_space<vmem>>, vector<32x16xf32>
    %1 = arith.truncf %0 : vector<32x16xf32> to vector<32x16xbf16>
    %c0_1 = arith.constant 0 : index
    %c0_2 = arith.constant 0 : index
    %2 = vector.load %arg4[%c0_1, %c0_2] : memref<16x32xbf16, #tpu.memory_space<vmem>>, vector<16x32xbf16>
    %cst = arith.constant dense<0.000000e+00> : vector<32x32xf32>
    %3 = tpu.matmul %1, %2, %cst {dimension_numbers = #tpu.dot_dimension_numbers<[1], [0], [0], [1], [0, 0, 1, 1], [], []>} : vector<32x16xbf16>, vector<16x32xbf16>, vector<32x32xf32> -> vector<32x32xf32>
    %c0_3 = arith.constant 0 : index
    %c0_4 = arith.constant 0 : index
    %4 = vector.load %arg5[%c0_3, %c0_4] : memref<1x32xf32, #tpu.memory_space<vmem>>, vector<1x32xf32>
    %5 = vector.broadcast %4 : vector<1x32xf32> to vector<32x32xf32>
    %6 = arith.addf %3, %5 : vector<32x32xf32>
    %c0_5 = arith.constant 0 : index
    %c0_6 = arith.constant 0 : index
    %7 = vector.load %arg2[%c0_5, %c0_6] : memref<32x16xf32, #tpu.memory_space<vmem>>, vector<32x16xf32>
    %8 = arith.truncf %7 : vector<32x16xf32> to vector<32x16xbf16>
    %c0_7 = arith.constant 0 : index
    %c0_8 = arith.constant 0 : index
    %9 = vector.load %arg6[%c0_7, %c0_8] : memref<16x32xbf16, #tpu.memory_space<vmem>>, vector<16x32xbf16>
    %cst_9 = arith.constant dense<0.000000e+00> : vector<32x32xf32>
    %10 = tpu.matmul %8, %9, %cst_9 {dimension_numbers = #tpu.dot_dimension_numbers<[1], [0], [0], [1], [0, 0, 1, 1], [], []>} : vector<32x16xbf16>, vector<16x32xbf16>, vector<32x32xf32> -> vector<32x32xf32>
    %c0_10 = arith.constant 0 : index
    %c0_11 = arith.constant 0 : index
    %11 = vector.load %arg7[%c0_10, %c0_11] : memref<1x32xf32, #tpu.memory_space<vmem>>, vector<1x32xf32>
    %12 = vector.broadcast %11 : vector<1x32xf32> to vector<32x32xf32>
    %13 = arith.addf %10, %12 : vector<32x32xf32>
    %c0_12 = arith.constant 0 : index
    %c0_13 = arith.constant 0 : index
    %14 = vector.load %arg3[%c0_12, %c0_13] : memref<32x32xf32, #tpu.memory_space<vmem>>, vector<32x32xf32>
    %15 = arith.truncf %14 : vector<32x32xf32> to vector<32x32xbf16>
    %c0_14 = arith.constant 0 : index
    %c0_15 = arith.constant 0 : index
    %16 = vector.load %arg8[%c0_14, %c0_15] : memref<32x32xbf16, #tpu.memory_space<vmem>>, vector<32x32xbf16>
    %cst_16 = arith.constant dense<0.000000e+00> : vector<32x32xf32>
    %17 = tpu.matmul %15, %16, %cst_16 {dimension_numbers = #tpu.dot_dimension_numbers<[1], [0], [0], [1], [0, 0, 1, 1], [], []>} : vector<32x32xbf16>, vector<32x32xbf16>, vector<32x32xf32> -> vector<32x32xf32>
    %c0_17 = arith.constant 0 : index
    %c0_18 = arith.constant 0 : index
    %18 = vector.load %arg9[%c0_17, %c0_18] : memref<1x32xf32, #tpu.memory_space<vmem>>, vector<1x32xf32>
    %19 = vector.broadcast %18 : vector<1x32xf32> to vector<32x32xf32>
    %20 = arith.addf %17, %19 : vector<32x32xf32>
    %21 = vector.shape_cast %6 : vector<32x32xf32> to vector<4x8x32xf32>
    %22 = vector.shape_cast %13 : vector<32x32xf32> to vector<4x8x32xf32>
    %23 = vector.shape_cast %20 : vector<32x32xf32> to vector<4x8x32xf32>
    %24 = arith.truncf %21 : vector<4x8x32xf32> to vector<4x8x32xbf16>
    %25 = arith.truncf %22 : vector<4x8x32xf32> to vector<4x8x32xbf16>
    "tpu.trace_start"() <{level = 10 : i32, message = "bqd,bkd->bqk"}> : () -> ()
    %cst_19 = arith.constant dense<0.000000e+00> : vector<4x8x8xf32>
    %26 = tpu.matmul %24, %25, %cst_19 {dimension_numbers = #tpu.dot_dimension_numbers<[2], [2], [1], [1], [0, 0, 0, 1, 1, 1], [0], [0]>} : vector<4x8x32xbf16>, vector<4x8x32xbf16>, vector<4x8x8xf32> -> vector<4x8x8xf32>
    "tpu.trace_stop"() : () -> ()
    %cst_20 = arith.constant dense<0xFF800000> : vector<4x8xf32>
    %27 = vector.multi_reduction <maximumf>, %26, %cst_20 [2] : vector<4x8x8xf32> to vector<4x8xf32>
    %28 = vector.shape_cast %27 : vector<4x8xf32> to vector<4x8x1xf32>
    %29 = vector.broadcast %28 : vector<4x8x1xf32> to vector<4x8x8xf32>
    %30 = arith.subf %26, %29 : vector<4x8x8xf32>
    %31 = math.exp %30 : vector<4x8x8xf32>
    %cst_21 = arith.constant dense<0.000000e+00> : vector<4x8xf32>
    %32 = vector.multi_reduction <add>, %31, %cst_21 [2] : vector<4x8x8xf32> to vector<4x8xf32>
    %33 = vector.shape_cast %32 : vector<4x8xf32> to vector<4x8x1xf32>
    %34 = tpu.reciprocal %33 {approx = true} : vector<4x8x1xf32> -> vector<4x8x1xf32>
    %35 = vector.broadcast %34 : vector<4x8x1xf32> to vector<4x8x8xf32>
    %36 = arith.mulf %31, %35 : vector<4x8x8xf32>
    %37 = arith.truncf %36 : vector<4x8x8xf32> to vector<4x8x8xbf16>
    %38 = arith.truncf %23 : vector<4x8x32xf32> to vector<4x8x32xbf16>
    "tpu.trace_start"() <{level = 10 : i32, message = "bqk,bkd->bqd"}> : () -> ()
    %cst_22 = arith.constant dense<0.000000e+00> : vector<4x8x32xf32>
    %39 = tpu.matmul %37, %38, %cst_22 {dimension_numbers = #tpu.dot_dimension_numbers<[2], [1], [1], [2], [0, 0, 0, 1, 1, 2], [0], [0]>} : vector<4x8x8xbf16>, vector<4x8x32xbf16>, vector<4x8x32xf32> -> vector<4x8x32xf32>
    %cst_23 = arith.constant 0.000000e+00 : f32
    "tpu.trace_stop"() : () -> ()
    %40 = vector.broadcast %cst_23 : f32 to vector<4x8x32xf32>
    %41 = arith.cmpf ogt, %39, %40 : vector<4x8x32xf32>
    %cst_24 = arith.constant 2.000000e-01 : f32
    %42 = vector.broadcast %cst_24 : f32 to vector<4x8x32xf32>
    %43 = arith.mulf %42, %39 : vector<4x8x32xf32>
    %44 = arith.select %41, %39, %43 : vector<4x8x32xi1>, vector<4x8x32xf32>
    %45 = vector.shape_cast %44 : vector<4x8x32xf32> to vector<32x32xf32>
    %c0_25 = arith.constant 0 : index
    %c0_26 = arith.constant 0 : index
    %46 = vector.load %arg10[%c0_25, %c0_26] : memref<32x32xf32, #tpu.memory_space<vmem>>, vector<32x32xf32>
    tpu.vector_store %arg10[%c0_25, %c0_26], %45 {strides = array<i32>} : memref<32x32xf32, #tpu.memory_space<vmem>>, vector<32x32xf32>,
    return
  }
  func.func @transform_0(%arg0: i32) -> (i32, i32) {
    %c0_i32 = arith.constant 0 : i32
    %c0_i32_0 = arith.constant 0 : i32
    return %arg0, %c0_i32 : i32, i32
  }
  func.func @transform_1(%arg0: i32) -> (i32, i32) {
    %c0_i32 = arith.constant 0 : i32
    %c0_i32_0 = arith.constant 0 : i32
    return %arg0, %c0_i32 : i32, i32
  }
  func.func @transform_2(%arg0: i32) -> (i32, i32) {
    %c0_i32 = arith.constant 0 : i32
    %c0_i32_0 = arith.constant 0 : i32
    return %arg0, %c0_i32 : i32, i32
  }
  func.func @transform_3(%arg0: i32) -> (i32, i32) {
    %c0_i32 = arith.constant 0 : i32
    %c0_i32_0 = arith.constant 0 : i32
    %c0_i32_1 = arith.constant 0 : i32
    return %c0_i32, %c0_i32_0 : i32, i32
  }
  func.func @transform_4(%arg0: i32) -> (i32, i32) {
    %c0_i32 = arith.constant 0 : i32
    %c0_i32_0 = arith.constant 0 : i32
    %c0_i32_1 = arith.constant 0 : i32
    return %c0_i32, %c0_i32_0 : i32, i32
  }
  func.func @transform_5(%arg0: i32) -> (i32, i32) {
    %c0_i32 = arith.constant 0 : i32
    %c0_i32_0 = arith.constant 0 : i32
    %c0_i32_1 = arith.constant 0 : i32
    return %c0_i32, %c0_i32_0 : i32, i32
  }
  func.func @transform_6(%arg0: i32) -> (i32, i32) {
    %c0_i32 = arith.constant 0 : i32
    %c0_i32_0 = arith.constant 0 : i32
    %c0_i32_1 = arith.constant 0 : i32
    return %c0_i32, %c0_i32_0 : i32, i32
  }
  func.func @transform_7(%arg0: i32) -> (i32, i32) {
    %c0_i32 = arith.constant 0 : i32
    %c0_i32_0 = arith.constant 0 : i32
    %c0_i32_1 = arith.constant 0 : i32
    return %c0_i32, %c0_i32_0 : i32, i32
  }
  func.func @transform_8(%arg0: i32) -> (i32, i32) {
    %c0_i32 = arith.constant 0 : i32
    %c0_i32_0 = arith.constant 0 : i32
    %c0_i32_1 = arith.constant 0 : i32
    return %c0_i32, %c0_i32_0 : i32, i32
  }
  func.func @transform_9(%arg0: i32) -> (i32, i32) {
    %c0_i32 = arith.constant 0 : i32
    %c0_i32_0 = arith.constant 0 : i32
    return %arg0, %c0_i32 : i32, i32
  }
}

</mosaic_0001>

<bundles_post_ra>
// kernel: tpu_custom_call.1
= control target key start
LH: loop header
LB: loop body
LE: loop exit
PB: predicated region body
PF: predicated region fallthrough
CT: control target
= control target key end

     0   :  { %vm55_vm0 = vcmask 130048   ;;  %s1082_s0 = inlined_call_operand.vmem [shape: f32[32,16], index: 0, kind: input, shape index: {}]   ;;  %s1083_s1 = inlined_call_operand.vmem [shape: f32[32,16], index: 1, kind: input, shape index: {}]   ;;  %s1084_s2 = inlined_call_operand.vmem [shape: f32[32,32], index: 2, kind: input, shape index: {}]   ;;  %s1085_s3 = inlined_call_operand.vmem [shape: bf16[16,32], index: 3, kind: input, shape index: {}]   ;;  %s1086_s4 = inlined_call_operand.vmem [shape: f32[1,32], index: 4, kind: input, shape index: {}]   ;;  %s1087_s5 = inlined_call_operand.vmem [shape: bf16[16,32], index: 5, kind: input, shape index: {}]   ;;  %s1088_s6 = inlined_call_operand.vmem [shape: f32[1,32], index: 6, kind: input, shape index: {}]   ;;  %s1089_s7 = inlined_call_operand.vmem [shape: bf16[32,32], index: 7, kind: input, shape index: {}]   ;;  %s1090_s8 = inlined_call_operand.vmem [shape: f32[1,32], index: 8, kind: input, shape index: {}]   ;;  %s1091_s9 = inlined_call_operand.hbm [shape: f32[32,32], index: 9, kind: output, shape index: {}]  }
   0x1   :  { %v854_v0 = vld [vmem:[%s1087_s5] sm:$0xff]   ;;  %v112_v2 = vld [vmem:[%s1083_s1 + $0x8] sm:$0xff]  ;;  %v113_v3 = vld [vmem:[%s1083_s1 + $0x10] sm:$0xff] }
   0x2   :  { %v111_v1 = vld [vmem:[%s1083_s1] sm:$0xff]  ;;  %787 = vmatprep.subr.bf16.mxu1 %v854_v0  ;;  %v114_v5 = vld [vmem:[%s1083_s1 + $0x18] sm:$0xff]  ;;  %v35_v9 = vld [vmem:[%s1082_s0 + $0x8] sm:$0xff] }
   0x3   :  { %v115_v4 = vpack.c.bf16 %v112_v2, %v111_v1  ;;  %788 = vmatpush3.bf16.msra.mxu1 %v854_v0  ;;  %v116_v6 = vpack.c.bf16 %v114_v5, %v113_v3  ;;  %v855_v7 = vld [vmem:[%s1085_s3] sm:$0xff]   ;;  %v36_v11 = vld [vmem:[%s1082_s0 + $0x10] sm:$0xff]  ;;  %v37_v12 = vld [vmem:[%s1082_s0 + $0x18] sm:$0xff] }
   0x4   :  { %v34_v8 = vld [vmem:[%s1082_s0] sm:$0xff]  ;;  %781 = vmatprep.subr.bf16.mxu0 %v855_v7  ;;  %v39_v13 = vpack.c.bf16 %v37_v12, %v36_v11 }
   0x5   :  { %789 = vmatprep.mubr.msk.bf16.mxu1 %vm55_vm0, %v115_v4  ;;  %v38_v10 = vpack.c.bf16 %v35_v9, %v34_v8  ;;  %v856_v14 = vld [vmem:[%s1089_s7] sm:$0xff]   ;;  %782 = vmatpush3.bf16.msra.mxu0 %v855_v7 }
   0x6   :  { %790 = vmatmul.mubr.msk.bf16.vlgmr.msra.gmra.mrb[0].mxu1 %vm55_vm0, %v116_v6 }
   0x7   :  { %14 = vsyncpa [#allocation3], 0  ;;  %783 = vmatprep.mubr.msk.bf16.mxu0 %vm55_vm0, %v38_v10  ;;  %793 = vmatprep.subr.bf16.mxu0 %v856_v14  ;;  %v857_v15 = vld [vmem:[%s1089_s7 + $0x8] sm:$0xff]   ;;  %vm216_vm1 = vcmask 261120   ;;  %v187_v16 = vld [vmem:[%s1084_s2] sm:$0xff]  ;;  %v898_v22 = vmov 0.0  }
   0x8   :  { %784 = vmatmul.mubr.msk.bf16.vlgmr.msra.gmra.mrb[0].mxu0 %vm55_vm0, %v39_v13  ;;  %v188_v17 = vld [vmem:[%s1084_s2 + $0x8] sm:$0xff]  ;;  %v189_v19 = vld [vmem:[%s1084_s2 + $0x10] sm:$0xff]  ;;  %v190_v20 = vld [vmem:[%s1084_s2 + $0x18] sm:$0xff]  ;;  %801 = vmatprep.subr.bf16.mxu1 %v898_v22  ;;  %vm899_vm2 = vmmov 0   ;;  %vm520_vm3 = vcmask 1043456   ;;  %vm464_vm4 = vcmask 64512  }
   0x9   :  { %794 = vmatpush3.bf16.msra.mxu0 %v856_v14  ;;  %v191_v18 = vpack.c.bf16 %v188_v17, %v187_v16  ;;  %v192_v21 = vpack.c.bf16 %v190_v20, %v189_v19  ;;  %803 = vmatprep.mubr.msk.bf16.mxu1 %vm899_vm2, %v898_v22  ;;  %v738_v23 = vld [vmem:[%s1088_s6] ss:$0 sm:$0xff] }
   0xa   :  { %795 = vmatprep.subr.bf16.mxu0 %v857_v15  ;;  %v734_v30 = vld [vmem:[%s1086_s4] ss:$0 sm:$0xff] }
   0xb   :  { %797 = vmatprep.mubr.msk.bf16.mxu0 %vm216_vm1, %v191_v18  ;;  %v742_v53 = vld [vmem:[%s1090_s8] ss:$0 sm:$0xff]  ;;  %s900_s8 = smov [#allocation2]  }
   0xc   :  { %s723_s18 = sshll.u32 %s900_s8, 4  ;;  %s724_s18 = int_to_ptr.vmem [resolvable:$true] %s723_s18 }
   0xd   :  { %796 = vmatpush3.bf16.msra.mxu0 %v857_v15  ;;  %s874_s5 = scalar_lea.vmem %s724_s18, 512  ;;  %p879_p1 = scmp.lt.s32.totalorder %s724_s18, %s724_s18 }
   0xe   :  { %807 = vmatprep.subr.bf16.mxu0 %v898_v22  ;;  %p875_p0 = scmp.ne.s32.totalorder %s724_s18, %s874_s5  ;;  %p880_p2 = scmp.lt.s32.totalorder %s874_s5, %s874_s5 }
  0x10   :  { %798 = vmatmul.mubr.msk.bf16.vlgmr.msra.gmra.mrb[4].mxu0 %vm216_vm1, %v192_v21  ;;  %p881_p3 = por %p880_p2, %p879_p1 }
  0x11   :  { %809 = vmatprep.mubr.msk.bf16.mxu0 %vm899_vm2, %v898_v22 }
  0x12   :  { %p882_p4 = pnand %p881_p3, %p875_p0 }
  0xd9   :  { %v791_v24 = vpop.f32.mrb[0].mxu1 }
  0xda   :  { %v172_v25 = vpop.f32.mrb[1].mxu1  ;;  %v181_v35 = vadd.f32 %v791_v24, %v738_v23 }
  0xdb   :  { %v173_v26 = vadd.f32 %v738_v23, %v172_v25  ;;  %v792_v27 = vpop.f32.mrb[2].mxu1  ;;  %v785_v29 = vpop.f32.mrb[0].mxu0 }
  0xdc   :  { %v175_v28 = vpop.f32.mrb[3].mxu1  ;;  %v96_v33 = vpop.f32.mrb[1].mxu0  ;;  %v184_v40 = vadd.f32 %v792_v27, %v738_v23  ;;  %v278_v42 = vpack.c.bf16 %v181_v35, %v181_v35  ;;  %v105_v49 = vadd.f32 %v785_v29, %v734_v30 }
  0xdd   :  { %v276_v31 = vpack.c.bf16 %v173_v26, %v173_v26  ;;  %v176_v32 = vadd.f32 %v738_v23, %v175_v28  ;;  %v786_v34 = vpop.f32.mrb[2].mxu0  ;;  %v97_v38 = vadd.f32 %v734_v30, %v96_v33 }
  0xde   :  { %v99_v39 = vpop.f32.mrb[3].mxu0  ;;  %v279_v45 = vpack.c.bf16 %v184_v40, %v184_v40  ;;  %v376_v46 = vsel %vm216_vm1, %v278_v42, 0  ;;  %v108_v50 = vadd.f32 %v786_v34, %v734_v30  ;;  %v274_v51 = vpack.c.bf16 %v105_v49, %v105_v49 }
  0xdf   :  { %v284_v36 = vsel %vm216_vm1, %v276_v31, 0  ;;  %v277_v37 = vpack.c.bf16 %v176_v32, %v176_v32  ;;  %v272_v43 = vpack.c.bf16 %v97_v38, %v97_v38  ;;  %v100_v44 = vadd.f32 %v734_v30, %v99_v39 }
  0xe0   :  { %802 = vmatpush3.bf16.xpose.msra.mxu1 %v284_v36  ;;  %v422_v48 = vsel %vm216_vm1, %v279_v45, 0  ;;  %v275_v52 = vpack.c.bf16 %v108_v50, %v108_v50 }
  0xe1   :  { %v330_v41 = vsel %vm216_vm1, %v277_v37, 0  ;;  %813 = vmatprep.subr.bf16.mxu1 %v898_v22  ;;  %v273_v47 = vpack.c.bf16 %v100_v44, %v100_v44 }
  0xe2   :  { %808 = vmatpush3.bf16.xpose.msra.mxu0 %v330_v41 }
  0xe3   :  { %819 = vmatprep.subr.bf16.mxu0 %v898_v22  ;;  %v799_v54 = vpop.f32.mrb[4].mxu0 }
  0xe4   :  { %v266_v55 = vadd.f32 %v799_v54, %v742_v53  ;;  %v257_v56 = vpop.f32.mrb[5].mxu0 }
  0xe5   :  { %v258_v57 = vadd.f32 %v742_v53, %v257_v56  ;;  %v800_v58 = vpop.f32.mrb[6].mxu0 }
  0xe6   :  { %v515_v59 = vpack.c.bf16 %v266_v55, %v266_v55  ;;  %v269_v60 = vadd.f32 %v800_v58, %v742_v53  ;;  %v260_v61 = vpop.f32.mrb[7].mxu0 }
  0xe7   :  { %804 = vmatmul.mubr.msk.bf16.vlgmr.msra.gmra.mrb[4].mxu1 %vm216_vm1, %v272_v43  ;;  %v513_v62 = vpack.c.bf16 %v258_v57, %v258_v57  ;;  %v261_v63 = vadd.f32 %v742_v53, %v260_v61 }
  0xe8   :  { %814 = vmatpush3.bf16.xpose.msra.mxu1 %v376_v46  ;;  %815 = vmatprep.mubr.msk.bf16.mxu1 %vm899_vm2, %v898_v22  ;;  %v1042_v0 = vsel %vm520_vm3, %v515_v59, 0  ;;  %v516_v1 = vpack.c.bf16 %v269_v60, %v269_v60 }
  0xe9   :  { %810 = vmatmul.mubr.msk.bf16.vlgmr.msra.gmra.mrb[8].mxu0 %vm216_vm1, %v273_v47  ;;  %825 = vmatprep.subr.bf16.mxu1 %v898_v22  ;;  %v522_v2 = vsel %vm520_vm3, %v513_v62, 0  ;;  %v514_v3 = vpack.c.bf16 %v261_v63, %v261_v63 }
  0xea   :  { %820 = vmatpush3.bf16.xpose.msra.mxu0 %v422_v48  ;;  %821 = vmatprep.mubr.msk.bf16.mxu0 %vm899_vm2, %v898_v22  ;;  %v1044_v4 = vsel %vm520_vm3, %v516_v1, 0 }
  0xeb   :  { %831 = vmatprep.subr.bf16.mxu0 %v898_v22  ;;  %v568_v5 = vsel %vm520_vm3, %v514_v3, 0 }
  0xef   :  { %816 = vmatmul.mubr.msk.bf16.vlgmr.msra.gmra.mrb[8].mxu1 %vm216_vm1, %v274_v51 }
  0xf0   :  { %827 = vmatprep.mubr.msk.bf16.mxu1 %vm899_vm2, %v898_v22  ;;  %826 = vmatpush3.bf16.msra.mxu1 %v522_v2 }
  0xf1   :  { %822 = vmatmul.mubr.msk.bf16.vlgmr.msra.gmra.mrb[12].mxu0 %vm216_vm1, %v275_v52  ;;  %837 = vmatprep.subr.bf16.mxu1 %v898_v22 }
  0xf2   :  { %833 = vmatprep.mubr.msk.bf16.mxu0 %vm899_vm2, %v898_v22  ;;  %832 = vmatpush3.bf16.msra.mxu0 %v568_v5 }
  0xf3   :  { %843 = vmatprep.subr.bf16.mxu0 %v898_v22 }
 0x1ba   :  { %v320_v6 = vpop.f32.mrb[4].mxu1 }
 0x1bb   :  { %v805_v7 = vpop.f32.mrb[5].mxu1  ;;  %v465_v8 = vsel %vm464_vm4, %v320_v6, -inf }
 0x1bc   :  { %v366_v9 = vpop.f32.mrb[8].mxu0  ;;  %466 = vmax.xlane.f32.xlu0 %v465_v8  ;;  %v323_v10 = vpop.f32.mrb[6].mxu1 }
 0x1bd   :  { %v806_v11 = vpop.f32.mrb[7].mxu1  ;;  %v811_v12 = vpop.f32.mrb[9].mxu0  ;;  %v468_v15 = vsel %vm464_vm4, %v366_v9, -inf }
 0x1be   :  { %v369_v13 = vpop.f32.mrb[10].mxu0 }
 0x1bf   :  { %v812_v14 = vpop.f32.mrb[11].mxu0 }
 0x1c0   :  { %469 = vmax.xlane.f32.xlu0 %v468_v15 }
 0x1c2   :  { %v412_v16 = vpop.f32.mrb[8].mxu1 }
 0x1c3   :  { %v817_v17 = vpop.f32.mrb[9].mxu1  ;;  %v471_v18 = vsel %vm464_vm4, %v412_v16, -inf }
 0x1c4   :  { %v458_v19 = vpop.f32.mrb[12].mxu0  ;;  %472 = vmax.xlane.f32.xlu1 %v471_v18  ;;  %v415_v20 = vpop.f32.mrb[10].mxu1 }
 0x1c5   :  { %v818_v21 = vpop.f32.mrb[11].mxu1  ;;  %v823_v23 = vpop.f32.mrb[13].mxu0  ;;  %v474_v26 = vsel %vm464_vm4, %v458_v19, -inf }
 0x1c6   :  { %v461_v24 = vpop.f32.mrb[14].mxu0 }
 0x1c7   :  { %v824_v25 = vpop.f32.mrb[15].mxu0 }
 0x1c8   :  { %475 = vmax.xlane.f32.xlu1 %v474_v26 }
 0x249   :  { %v467_v27 = vpop.xlane.xlu0 %466 }
 0x24a   :  { %v477_v28 = vsub.f32 %v320_v6, %v467_v27 }
 0x24c   :  { %v481_v29 = vmul.f32 1.442695, %v477_v28 }
 0x24d   :  { %v470_v30 = vpop.xlane.xlu0 %469 }
 0x24e   :  { %858 = vpow2.f32 %v481_v29  ;;  %v478_v31 = vsub.f32 %v366_v9, %v470_v30 }
 0x250   :  { %v483_v32 = vmul.f32 1.442695, %v478_v31 }
 0x251   :  { %v473_v33 = vpop.xlane.xlu1 %472 }
 0x252   :  { %860 = vpow2.f32 %v483_v32  ;;  %v479_v34 = vsub.f32 %v412_v16, %v473_v33 }
 0x254   :  { %v485_v35 = vmul.f32 1.442695, %v479_v34 }
 0x255   :  { %v476_v36 = vpop.xlane.xlu1 %475 }
 0x256   :  { %862 = vpow2.f32 %v485_v35  ;;  %v480_v37 = vsub.f32 %v458_v19, %v476_v36 }
 0x258   :  { %v859_v38 = vpop.eup %858  ;;  %v487_v39 = vmul.f32 1.442695, %v480_v37 }
 0x259   :  { %v489_v40 = vsel %vm464_vm4, %v859_v38, 0.0 }
 0x25a   :  { %864 = vpow2.f32 %v487_v39  ;;  %490 = vadd.xlane.f32.xlu0 %v489_v40 }
 0x25c   :  { %v861_v41 = vpop.eup %860 }
 0x25d   :  { %v492_v42 = vsel %vm464_vm4, %v861_v41, 0.0 }
 0x25e   :  { %493 = vadd.xlane.f32.xlu1 %v492_v42 }
 0x260   :  { %v863_v43 = vpop.eup %862 }
 0x261   :  { %v495_v44 = vsel %vm464_vm4, %v863_v43, 0.0 }
 0x262   :  { %496 = vadd.xlane.f32.xlu0 %v495_v44 }
 0x264   :  { %v865_v45 = vpop.eup %864 }
 0x265   :  { %v498_v46 = vsel %vm464_vm4, %v865_v45, 0.0 }
 0x266   :  { %499 = vadd.xlane.f32.xlu1 %v498_v46 }
 0x2e7   :  { %v491_v47 = vpop.xlane.xlu0 %490 }
 0x2e8   :  { %866 = vrcp.f32 %v491_v47 }
 0x2eb   :  { %v494_v48 = vpop.xlane.xlu1 %493 }
 0x2ec   :  { %868 = vrcp.f32 %v494_v48 }
 0x2ef   :  { %v497_v49 = vpop.xlane.xlu0 %496 }
 0x2f0   :  { %870 = vrcp.f32 %v497_v49 }
 0x2f2   :  { %v867_v50 = vpop.eup %866 }
 0x2f3   :  { %v505_v51 = vmul.f32 %v867_v50, %v859_v38  ;;  %v500_v52 = vpop.xlane.xlu1 %499 }
 0x2f4   :  { %872 = vrcp.f32 %v500_v52 }
 0x2f5   :  { %v509_v53 = vpack.c.bf16 %v505_v51, %v505_v51 }
 0x2f6   :  { %v869_v54 = vpop.eup %868 }
 0x2f7   :  { %v506_v55 = vmul.f32 %v869_v54, %v861_v41  ;;  %828 = vmatmul.mubr.msk.bf16.vlgmr.msra.gmra.mrb[12].mxu1 %vm464_vm4, %v509_v53 }
 0x2f8   :  { %838 = vmatpush3.bf16.msra.mxu1 %v1042_v0  ;;  %839 = vmatprep.mubr.msk.bf16.mxu1 %vm899_vm2, %v898_v22 }
 0x2f9   :  { %v510_v56 = vpack.c.bf16 %v506_v55, %v506_v55 }
 0x2fa   :  { %v871_v57 = vpop.eup %870 }
 0x2fb   :  { %v507_v58 = vmul.f32 %v871_v57, %v863_v43  ;;  %834 = vmatmul.mubr.msk.bf16.vlgmr.msra.gmra.mrb[16].mxu0 %vm464_vm4, %v510_v56 }
 0x2fc   :  { %844 = vmatpush3.bf16.msra.mxu0 %v1044_v4  ;;  %845 = vmatprep.mubr.msk.bf16.mxu0 %vm899_vm2, %v898_v22 }
 0x2fd   :  { %v511_v59 = vpack.c.bf16 %v507_v58, %v507_v58 }
 0x2fe   :  { %v873_v60 = vpop.eup %872 }
 0x2ff   :  { %v508_v61 = vmul.f32 %v873_v60, %v865_v45  ;;  %840 = vmatmul.mubr.msk.bf16.vlgmr.msra.gmra.mrb[16].mxu1 %vm464_vm4, %v511_v59 }
 0x301   :  { %v512_v62 = vpack.c.bf16 %v508_v61, %v508_v61 }
 0x303   :  { %846 = vmatmul.mubr.msk.bf16.vlgmr.msra.gmra.mrb[20].mxu0 %vm464_vm4, %v512_v62 }
 0x3ca   :  { %v558_v63 = vpop.f32.mrb[12].mxu1 }
 0x3cb   :  { %vm702_vm5 = vcmp.gt.f32.partialorder %v558_v63, 0.0  ;;  %v706_v0 = vmul.f32 0.2, %v558_v63  ;;  %v829_v1 = vpop.f32.mrb[13].mxu1 }
 0x3cc   :  { %v561_v2 = vpop.f32.mrb[14].mxu1 }
 0x3cd   :  { %v710_v3 = vsel %vm702_vm5, %v558_v63, %v706_v0  ;;  %v830_v5 = vpop.f32.mrb[15].mxu1 }
 0x3ce   :  { %714 = vst.msk [vmem:[#allocation2] sm:$0xff] %vm216_vm1, %v710_v3  ;;  %v604_v4 = vpop.f32.mrb[16].mxu0 }
 0x3cf   :  { %vm703_vm6 = vcmp.gt.f32.partialorder %v604_v4, 0.0  ;;  %v707_v22 = vmul.f32 0.2, %v604_v4  ;;  %v835_v6 = vpop.f32.mrb[17].mxu0 }
 0x3d0   :  { %v607_v7 = vpop.f32.mrb[18].mxu0 }
 0x3d1   :  { %v711_v8 = vsel %vm703_vm6, %v604_v4, %v707_v22  ;;  %v836_v9 = vpop.f32.mrb[19].mxu0 }
 0x3d2   :  { %715 = vst.msk [vmem:[#allocation2 + $0x8] sm:$0xff] %vm216_vm1, %v711_v8  ;;  %v650_v10 = vpop.f32.mrb[16].mxu1 }
 0x3d3   :  { %vm704_vm7 = vcmp.gt.f32.partialorder %v650_v10, 0.0  ;;  %v708_v11 = vmul.f32 0.2, %v650_v10  ;;  %v841_v12 = vpop.f32.mrb[17].mxu1 }
 0x3d4   :  { %v653_v13 = vpop.f32.mrb[18].mxu1 }
 0x3d5   :  { %v712_v14 = vsel %vm704_vm7, %v650_v10, %v708_v11  ;;  %v842_v15 = vpop.f32.mrb[19].mxu1 }
 0x3d6   :  { %716 = vst.msk [vmem:[#allocation2 + $0x10] sm:$0xff] %vm216_vm1, %v712_v14  ;;  %v696_v16 = vpop.f32.mrb[20].mxu0 }
 0x3d7   :  { %vm705_vm8 = vcmp.gt.f32.partialorder %v696_v16, 0.0  ;;  %v709_v17 = vmul.f32 0.2, %v696_v16  ;;  %v847_v18 = vpop.f32.mrb[21].mxu0 }
 0x3d8   :  { %v699_v19 = vpop.f32.mrb[22].mxu0 }
 0x3d9   :  { %v713_v20 = vsel %vm705_vm8, %v696_v16, %v709_v17  ;;  %v848_v21 = vpop.f32.mrb[23].mxu0 }
 0x3da   :  { %717 = vst.msk [vmem:[#allocation2 + $0x18] sm:$0xff] %vm216_vm1, %v713_v20 }
 0x3db   :  { %885 = shalt.err (!%p882_p4)
}
 0x3dc   :  { %s886_s21 = scalar_lea.hbm %s1091_s9, 512 }
 0x3dd   :  { %p887_p5 = scmp.ne.s32.totalorder %s1091_s9, %s886_s21  ;;  %p890_p6 = scmp.lt.u32.totalorder %s886_s21, %s1091_s9 }
 0x3df   :  { %p892_p7 = pnand %p890_p6, %p887_p5 }
 0x3e1   :  { %895 = shalt.err (!%p892_p7)
}
 0x3e2   :  { %s901_s1 = smov 128   ;;  %s902_s26 = smov 8  }
 0x3e3   :  { %729 = dma.vmem_to_hbm [thread:$0]  %s724_s18, 512, %s1091_s9, [#allocation3], %s901_s1, %s901_s1, %s902_s26  }
 0x3e4   :  { %896 = dma.done.wait [#allocation3], 512  }
 0x3e5   :  { %897 = vsyncadd [#allocation3], 4294966784 }
 0x3e6   :  { %733 = vsyncpa [#allocation3], 1 }

</bundles_post_ra>
